<compile_context>
chip_gen: v7x
topology: tpu7x:2x2x1
jax: 0.10.0
libtpu: 0.0.40
codegen_flags: <defaults>
</compile_context>

<pallas_src>
import math

import jax
import jax.numpy as jnp
from jax.experimental import pallas as pl
from jax.experimental.pallas import tpu as pltpu

_SQRT_2_OVER_PI = math.sqrt(2.0 / math.pi)
# gelu(x) = 0.5*x*(1 + tanh(sqrt(2/pi)*(x + 0.044715*x^3)))
#         = x * sigmoid(2*sqrt(2/pi)*(x + 0.044715*x^3))        (exact identity)
#         = x * sigmoid(x * (K1 + K2*x*x))
_K1 = 2.0 * _SQRT_2_OVER_PI
_K2 = 2.0 * 0.044715 * _SQRT_2_OVER_PI


def _make_gelu_kernel(compute_dtype):
    def kernel(x_ref, o_ref):
        x = x_ref[...].astype(compute_dtype)
        k1 = jnp.asarray(_K1, compute_dtype)
        k2 = jnp.asarray(_K2, compute_dtype)
        z = x * (k1 + k2 * (x * x))          # factored polynomial: 3 VALU ops
        # sigmoid via exp (EUP) + divide; exact rewrite of 0.5*(1+tanh(z/2)).
        y = x / (1.0 + jnp.exp(-z))
        o_ref[...] = y.astype(o_ref.dtype)

    return kernel


def _chip_profile():
    """(is_v5_family_or_older, small_vmem) from the attached TPU device."""
    kind = ""
    try:
        kind = jax.devices()[0].device_kind.lower()
    except Exception:
        pass
    is_v5_or_older = any(t in kind for t in ("v2", "v3", "v4", "v5"))
    small_vmem = "v7" in kind  # v7x: 64 MiB VMEM per TensorCore
    return is_v5_or_older, small_vmem


def _pick_lane_width(n):
    # Prefer wide, lane-dense (multiple-of-128) last dims -> unmasked vst and
    # few, large DMAs per grid step.
    for w in (8192, 4096, 2048, 1024, 512, 256, 128):
        if n % w == 0:
            return w
    # Ragged fallback: widest divisor of n (capped), never the model's tiny
    # last dim, so lane utilization stays as high as possible.
    cap = min(n, 4096)
    for w in range(cap, 0, -1):
        if n % w == 0:
            return w
    return 1


def _ceil_div(a, b):
    return -(-a // b)


def _round_up(v, m):
    return _ceil_div(v, m) * m


def _choose_row_block(rows, lane_w, dtype_bytes, budget_bytes):
    """Row block that fits the byte budget, is sublane-aligned, and (when the
    tensor is non-tiny) yields an even grid step count >= 4 so both v7x
    TensorCores get >= 2 pipelined blocks each."""
    sub = 16  # covers f32 (8,128) and bf16 (16,128) sublane packing
    row_bytes = max(1, lane_w * dtype_bytes)
    budget_rows = max(1, budget_bytes // row_bytes)   # clamp bytes, not rows
    if budget_rows >= sub:
        budget_rows = (budget_rows // sub) * sub
    block = min(rows, budget_rows)

    if rows >= 4 * sub:
        if _ceil_div(rows, block) < 4:
            block = min(block, _round_up(_ceil_div(rows, 4), sub))
        steps = _ceil_div(rows, block)
        if steps > 1 and steps % 2:
            for target in (steps + 1, steps + 3):
                cand = max(sub, _round_up(_ceil_div(rows, target), sub))
                if cand <= block and _ceil_div(rows, cand) % 2 == 0:
                    block = cand
                    break

    # (8,128) layout rule: a partial block's sublane dim must be a multiple
    # of 8 (or equal the full extent).
    if block < rows and block % 8 != 0:
        block = min(rows, max(8, (block // 8) * 8))
    return max(1, block)


def gelu_pallas(x, *, vmem_buffer_budget_bytes=None):
    """Tanh-approx GELU, elementwise, one Pallas TPU pass (HBM read + write)."""
    orig_shape = x.shape
    dtype = x.dtype
    n = x.size
    if n == 0:
        return x

    is_v5_family, small_vmem = _chip_profile()
    dtype_bytes = jnp.dtype(dtype).itemsize

    if vmem_buffer_budget_bytes is None:
        # v7x: smaller blocks (85% of roofline already at 1-4 MiB) to respect
        # 64 MiB VMEM; v5e/v6e: bigger blocks amortize per-grid-step overhead.
        vmem_buffer_budget_bytes = (4 << 20) if small_vmem else (8 << 20)

    # bf16 math on v6e/v7x keeps the kernel HBM-bound (half the VALU slot
    # pressure); v5e has no bf16 VPU/EUP, so compute in f32 there.
    if dtype == jnp.bfloat16 and not is_v5_family:
        compute_dtype = jnp.bfloat16
    else:
        compute_dtype = jnp.float32

    lane_w = _pick_lane_width(n)
    rows = n // lane_w
    x2d = x.reshape(rows, lane_w)

    row_block = _choose_row_block(rows, lane_w, dtype_bytes,
                                  vmem_buffer_budget_bytes)
    grid = (pl.cdiv(rows, row_block),)

    block_bytes = row_block * lane_w * dtype_bytes
    # 2 in + 2 out double-buffered blocks + scratch headroom; cap well below
    # the chip's physical VMEM (64 MiB/TC on v7x, 128 MiB on v5e/v6e).
    vmem_cap = (40 << 20) if small_vmem else (48 << 20)
    vmem_limit = min(max(4 * block_bytes + (4 << 20), 16 << 20), vmem_cap)

    cost = pl.CostEstimate(
        flops=6 * n,
        transcendentals=n,
        bytes_accessed=2 * n * dtype_bytes,
    )

    out = pl.pallas_call(
        _make_gelu_kernel(compute_dtype),
        out_shape=jax.ShapeDtypeStruct((rows, lane_w), dtype),
        grid_spec=pltpu.PrefetchScalarGridSpec(
            num_scalar_prefetch=0,
            grid=grid,
            in_specs=[pl.BlockSpec((row_block, lane_w), lambda i: (i, 0))],
            out_specs=pl.BlockSpec((row_block, lane_w), lambda i: (i, 0)),
        ),
        compiler_params=pltpu.CompilerParams(
            dimension_semantics=("parallel",),
            vmem_limit_bytes=vmem_limit,
        ),
        cost_estimate=cost,
    )(x2d)

    return out.reshape(orig_shape)


def gelu_reference(x):
    xf = x.astype(jnp.float32)
    c = jnp.float32(_SQRT_2_OVER_PI)
    y = 0.5 * xf * (1.0 + jnp.tanh(c * (xf + 0.044715 * jnp.power(xf, 3))))
    return y.astype(x.dtype)


if __name__ == "__main__":
    key = jax.random.PRNGKey(0)

    # GPT-2 style activation input: (batch, seq, hidden)
    batch, seq, hidden = 2, 8, 32
    x = jax.random.normal(key, (batch, seq, hidden), dtype=jnp.float32)

    y = jax.block_until_ready(gelu_pallas(x))
    y_ref = gelu_reference(x)
    assert y.shape == x.shape and y.dtype == x.dtype
    assert jnp.allclose(y, y_ref, atol=1e-5, rtol=1e-5)

    # bf16 input exercises the (chip-gated) bf16-compute path.
    xb = x.astype(jnp.bfloat16)
    yb = jax.block_until_ready(gelu_pallas(xb))
    assert yb.dtype == jnp.bfloat16
    assert jnp.allclose(yb.astype(jnp.float32),
                        gelu_reference(xb).astype(jnp.float32),
                        atol=2e-2, rtol=2e-2)

    # Ragged shape (element count not a multiple of 128) exercises the
    # widest-divisor fallback with no pad/slice HBM passes.
    xr = jax.random.normal(key, (3, 7, 5), dtype=jnp.float32)
    yr = jax.block_until_ready(gelu_pallas(xr))
    assert jnp.allclose(yr, gelu_reference(xr), atol=1e-5, rtol=1e-5)

    # Slightly larger lane-dense shape exercises the wide-lane reblocking path.
    xl = jax.random.normal(key, (4, 64, 256), dtype=jnp.float32)
    yl = jax.block_until_ready(gelu_pallas(xl))
    assert jnp.allclose(yl, gelu_reference(xl), atol=1e-5, rtol=1e-5)

    print("KERNEL_OK")
</pallas_src>

<mosaic_0001>
module attributes {stable_mosaic.version = 11 : i64} {
  func.func @kernel(%arg0: i32, %arg1: memref<1x512xf32, #tpu.memory_space<vmem>>, %arg2: memref<1x512xf32, #tpu.memory_space<vmem>>) attributes {dimension_semantics = [#tpu.dimension_semantics<parallel>], iteration_bounds = array<i64: 1>, scalar_prefetch = 0 : i64, scratch_operands = 0 : i64, tpu.core_type = #tpu.core_type<tc>, window_params = [{transform_indices = @transform_0, window_bounds = array<i64: 1, 512>}, {transform_indices = @transform_1, window_bounds = array<i64: 1, 512>}]} {
    %c0 = arith.constant 0 : index
    %c0_0 = arith.constant 0 : index
    %0 = vector.load %arg1[%c0, %c0_0] : memref<1x512xf32, #tpu.memory_space<vmem>>, vector<1x512xf32>
    %1 = arith.mulf %0, %0 : vector<1x512xf32>
    %cst = arith.constant 0.0713548139 : f32
    %2 = vector.broadcast %cst : f32 to vector<1x512xf32>
    %3 = arith.mulf %2, %1 : vector<1x512xf32>
    %cst_1 = arith.constant 1.59576917 : f32
    %4 = vector.broadcast %cst_1 : f32 to vector<1x512xf32>
    %5 = arith.addf %4, %3 : vector<1x512xf32>
    %6 = arith.mulf %0, %5 : vector<1x512xf32>
    %cst_2 = arith.constant 0.000000e+00 : f32
    %7 = vector.broadcast %cst_2 : f32 to vector<1x512xf32>
    %8 = arith.subf %7, %6 : vector<1x512xf32>
    %9 = math.exp %8 : vector<1x512xf32>
    %cst_3 = arith.constant 1.000000e+00 : f32
    %10 = vector.broadcast %cst_3 : f32 to vector<1x512xf32>
    %11 = arith.addf %10, %9 : vector<1x512xf32>
    %12 = arith.divf %0, %11 : vector<1x512xf32>
    %c0_4 = arith.constant 0 : index
    %c0_5 = arith.constant 0 : index
    %13 = vector.load %arg2[%c0_4, %c0_5] : memref<1x512xf32, #tpu.memory_space<vmem>>, vector<1x512xf32>
    tpu.vector_store %arg2[%c0_4, %c0_5], %12 {strides = array<i32>} : memref<1x512xf32, #tpu.memory_space<vmem>>, vector<1x512xf32>,
    return
  }
  func.func @transform_0(%arg0: i32) -> (i32, i32) {
    %c0_i32 = arith.constant 0 : i32
    %c0_i32_0 = arith.constant 0 : i32
    return %arg0, %c0_i32 : i32, i32
  }
  func.func @transform_1(%arg0: i32) -> (i32, i32) {
    %c0_i32 = arith.constant 0 : i32
    %c0_i32_0 = arith.constant 0 : i32
    return %arg0, %c0_i32 : i32, i32
  }
}

</mosaic_0001>

<bundles_post_ra>
// kernel: tpu_custom_call.1
= control target key start
LH: loop header
LB: loop body
LE: loop exit
PB: predicated region body
PF: predicated region fallthrough
CT: control target
= control target key end

     0   :  { %6 = vsyncpa [#allocation3], 0  ;;  %s142_s0 = inlined_call_operand.hbm [shape: f32[1,512], index: 0, kind: input, shape index: {}]   ;;  %s143_s1 = inlined_call_operand.hbm [shape: f32[1,512], index: 1, kind: output, shape index: {}]  }
   0x1   :  { %7 = vsyncpa [#allocation4], 0  ;;  %s106_s6 = smov [#allocation2]   ;;  %s58_s10 = scalar_lea.hbm %s142_s0, 64 }
   0x2   :  { %s14_s7 = sshll.u32 %s106_s6, 4  ;;  %p59_p0 = scmp.ne.s32.totalorder %s142_s0, %s58_s10  ;;  %s15_s7 = int_to_ptr.vmem [resolvable:$true] %s14_s7 }
   0x3   :  { %p62_p1 = scmp.lt.u32.totalorder %s58_s10, %s142_s0 }
   0x5   :  { %p64_p2 = pnand %p62_p1, %p59_p0 }
   0x7   :  { %67 = shalt.err (!%p64_p2)
}
   0x8   :  { %s68_s15 = scalar_lea.vmem %s15_s7, 64  ;;  %p73_p4 = scmp.lt.s32.totalorder %s15_s7, %s15_s7 }
   0x9   :  { %p69_p3 = scmp.ne.s32.totalorder %s15_s7, %s68_s15  ;;  %p74_p5 = scmp.lt.s32.totalorder %s68_s15, %s68_s15 }
   0xb   :  { %p75_p6 = por %p74_p5, %p73_p4 }
   0xd   :  { %p76_p7 = pnand %p75_p6, %p69_p3 }
   0xf   :  { %79 = shalt.err (!%p76_p7)
}
  0x10   :  { %17 = dma.hbm_to_vmem [thread:$0]  %s142_s0, 64, %s15_s7, [#allocation3]  }
  0x11   :  { %102 = dma.done.wait [#allocation3], 64  }
  0x12   :  { %103 = vsyncadd [#allocation3], 4294967232  ;;  %v21_v0 = vld [vmem:[#allocation2] sm:$0xf]  ;;  %v32_v9 = vlaneseq  ;;  %s107_s18 = smov [#allocation5]  }
  0x13   :  { %v22_v1 = vmul.f32 %v21_v0, %v21_v0  ;;  %s43_s19 = sshll.u32 %s107_s18, 4  ;;  %s44_s19 = int_to_ptr.vmem [resolvable:$true] %s43_s19 }
  0x14   :  { %vm34_vm0 = vcmp.lt.s32.totalorder %v32_v9, 512  ;;  %s80_s0 = scalar_lea.vmem %s44_s19, 64  ;;  %p85_p9 = scmp.lt.s32.totalorder %s44_s19, %s44_s19 }
  0x15   :  { %v23_v2 = vmul.f32 0.071354814, %v22_v1  ;;  %p81_p8 = scmp.ne.s32.totalorder %s44_s19, %s80_s0  ;;  %p86_p10 = scmp.lt.s32.totalorder %s80_s0, %s80_s0 }
  0x17   :  { %v24_v3 = vadd.f32 1.5957692, %v23_v2  ;;  %p87_p11 = por %p86_p10, %p85_p9 }
  0x19   :  { %v25_v4 = vmul.f32 %v24_v3, %v21_v0  ;;  %p88_p12 = pnand %p87_p11, %p81_p8 }
  0x1b   :  { %v26_v5 = vsub.f32 0.0, %v25_v4 }
  0x1d   :  { %v27_v6 = vmul.f32 1.442695, %v26_v5 }
  0x1f   :  { %54 = vpow2.f32 %v27_v6 }
  0x29   :  { %v55_v7 = vpop.eup %54 }
  0x2a   :  { %v29_v8 = vadd.f32 1.0, %v55_v7 }
  0x2c   :  { %56 = vrcp.f32 %v29_v8 }
  0x36   :  { %v57_v10 = vpop.eup %56 }
  0x37   :  { %v31_v11 = vmul.f32 %v57_v10, %v21_v0 }
  0x39   :  { %36 = vst.msk [vmem:[#allocation5] sm:$0xf] %vm34_vm0, %v31_v11 }
  0x3a   :  { %91 = shalt.err (!%p88_p12)
}
  0x3b   :  { %s92_s22 = scalar_lea.hbm %s143_s1, 64 }
  0x3c   :  { %p93_p13 = scmp.ne.s32.totalorder %s143_s1, %s92_s22  ;;  %p96_p0 = scmp.lt.u32.totalorder %s92_s22, %s143_s1 }
  0x3e   :  { %p98_p1 = pnand %p96_p0, %p93_p13 }
  0x40   :  { %101 = shalt.err (!%p98_p1)
}
  0x41   :  { %46 = dma.vmem_to_hbm [thread:$0]  %s44_s19, 64, %s143_s1, [#allocation4]  }
  0x42   :  { %104 = dma.done.wait [#allocation4], 64  }
  0x43   :  { %105 = vsyncadd [#allocation4], 4294967232 }
  0x44   :  { %50 = vsyncpa [#allocation3], 1 }
  0x45   :  { %51 = vsyncpa [#allocation4], 1 }

</bundles_post_ra>
